<compile_context>
chip_gen: v6e
topology: v6e:2x2x1
jax: 0.10.0
libtpu: 0.0.40
codegen_flags: <defaults>
</compile_context>

<pallas_src>
import functools

import jax
import jax.numpy as jnp
from jax.experimental import pallas as pl
from jax.experimental.pallas import tpu as pltpu


def _fused_cnn_kernel(n_layers, pad, l_ins, fuse_residual, *refs):
    """Fused Conv1d stack (+ optional residual add) for the whole network.

    refs layout: x_ref, (w_ref, b_ref) * n_layers, o_ref, buf_ref
      x_ref : (B, L0, C0)           channels-last input
      w_ref : (K, C_in, C_out)      per-layer conv weights, tap-major
      b_ref : (1, C_out)            per-layer bias
      o_ref : (B, L_final, C_last)  output
      buf   : (B, L_pad_max, C_max) VMEM scratch for zero-padded staging
    """
    x_ref = refs[0]
    o_ref = refs[1 + 2 * n_layers]
    buf = refs[2 + 2 * n_layers]
    B = x_ref.shape[0]

    h = x_ref[...]                                   # (B, L0, C0) f32, lives in VMEM/vregs
    for li in range(n_layers):
        w_ref = refs[1 + 2 * li]                     # (K, C_in, C_out)
        b_ref = refs[2 + 2 * li]                     # (1, C_out)
        K, C_in, C_out = w_ref.shape
        L_in = l_ins[li]
        L_out = L_in + 2 * pad - K + 1

        # In-kernel zero padding: zero the (tiny) scratch, then write the activation
        # into the middle; pad rows stay zero.
        buf[...] = jnp.zeros_like(buf)
        buf[:, pad:pad + L_in, :C_in] = h

        # Conv1d as a sum over kernel taps of (B*L_out, C_in) @ (C_in, C_out) MXU matmuls,
        # with batch folded into the M dimension (one matmul per tap for ALL batch elems).
        acc = jnp.dot(buf[:, 0:L_out, :C_in].reshape(B * L_out, C_in), w_ref[0],
                      preferred_element_type=jnp.float32)
        for k in range(1, K):
            xs = buf[:, k:k + L_out, :C_in].reshape(B * L_out, C_in)
            acc = acc + jnp.dot(xs, w_ref[k], preferred_element_type=jnp.float32)

        # Bias added once per layer on the accumulator (single broadcast).
        h = (acc + b_ref[...]).reshape(B, L_out, C_out)

    if fuse_residual:
        h = h + x_ref[...]                           # residual fused in-kernel
    o_ref[...] = h.astype(o_ref.dtype)


def fused_cnn_pallas(h, params, padding, fuse_residual):
    """Single pallas_call running the whole conv stack (and residual if requested)."""
    B, L0, C0 = h.shape
    n_layers = len(params)

    # Static per-layer input lengths (stride=1, dilation=1).
    l_ins = []
    L = L0
    for (w, _) in params:
        l_ins.append(L)
        L = L + 2 * padding - w.shape[2] + 1
    L_final = L
    C_last = params[-1][0].shape[0]
    L_pad_max = max(l + 2 * padding for l in l_ins)
    C_max = max(w.shape[1] for (w, _) in params)     # max C_in staged in the scratch

    inputs = [h.astype(jnp.float32)]
    for (w, b) in params:
        inputs.append(jnp.transpose(w, (2, 1, 0)).astype(jnp.float32))  # (K, C_in, C_out)
        inputs.append(b.reshape(1, -1).astype(jnp.float32))             # (1, C_out)

    kernel = functools.partial(_fused_cnn_kernel, n_layers, padding,
                               tuple(l_ins), fuse_residual)
    return pl.pallas_call(
        kernel,
        out_shape=jax.ShapeDtypeStruct((B, L_final, C_last), jnp.float32),
        scratch_shapes=[pltpu.VMEM((B, L_pad_max, C_max), jnp.float32)],
    )(*inputs)


def cnn_forward(x, params, padding):
    """Replicates CNN.forward from the PyTorch module.

    x: (B, L, C) or (B, F) float32 (torch's pre-permute layout).
    params: list of (weight (C_out, C_in, K), bias (C_out,)) per Conv1d layer.
    """
    x_in = x
    h = x[:, :, None] if x.ndim == 2 else x          # torch: x.unsqueeze(2)
    B, L0, _ = h.shape

    # Static shape of the conv-stack output.
    L = L0
    for (w, _) in params:
        L = L + 2 * padding - w.shape[2] + 1
    C_last = params[-1][0].shape[0]
    conv_shape = (B, L, C_last)

    # Fast path: torch.squeeze is a no-op and shapes match elementwise -> fuse the
    # residual add inside the kernel.
    fuse = (x_in.ndim == 3 and conv_shape == tuple(x_in.shape) and 1 not in conv_shape)
    out = fused_cnn_pallas(h, params, padding, fuse)
    if fuse:
        return out
    # General (rare) path: mirror torch.squeeze (drops ALL size-1 dims) + broadcasted add.
    # TODO(synk): this fallback runs the squeeze/add outside the fused kernel.
    return jnp.squeeze(out) + x_in


def _cnn_ref(x, params, padding):
    """Pure-JAX reference mirroring the PyTorch forward (for correctness check)."""
    x_in = x
    h = x[:, :, None] if x.ndim == 2 else x
    h = jnp.transpose(h, (0, 2, 1))                  # (B, C, L)  -- torch NCL
    for (w, b) in params:
        h = jax.lax.conv_general_dilated(
            h, w, window_strides=(1,), padding=[(padding, padding)],
            dimension_numbers=('NCH', 'OIH', 'NCH'))
        h = h + b[None, :, None]
    h = jnp.transpose(h, (0, 2, 1))                  # back to (B, L, C)
    return jnp.squeeze(h) + x_in


if __name__ == "__main__":
    layer_sizes = [4, 8, 8, 4]      # in-channels ... out-channels (residual needs first == last)
    kernel_size = 3
    padding = 1                     # 'same' length so the residual add is valid
    B, L = 2, 16

    key = jax.random.PRNGKey(0)
    n_layers = len(layer_sizes) - 1
    keys = jax.random.split(key, 2 * n_layers + 1)

    x = jax.random.normal(keys[0], (B, L, layer_sizes[0]), dtype=jnp.float32)

    # Deterministic parameter init mimicking torch.nn.Conv1d default (U(-sqrt(k), sqrt(k)),
    # k = 1 / (C_in * kernel_size)).
    params = []
    for i in range(1, len(layer_sizes)):
        c_in, c_out = layer_sizes[i - 1], layer_sizes[i]
        bound = 1.0 / (c_in * kernel_size) ** 0.5
        w = jax.random.uniform(keys[2 * i - 1], (c_out, c_in, kernel_size),
                               dtype=jnp.float32, minval=-bound, maxval=bound)
        b = jax.random.uniform(keys[2 * i], (c_out,),
                               dtype=jnp.float32, minval=-bound, maxval=bound)
        params.append((w, b))

    out = cnn_forward(x, params, padding)
    jax.block_until_ready(out)
    assert out.shape == (B, L, layer_sizes[-1]), out.shape

    ref = _cnn_ref(x, params, padding)
    assert bool(jnp.allclose(out, ref, atol=1e-5, rtol=1e-5)), "mismatch vs pure-JAX reference"

    print("KERNEL_OK")
</pallas_src>

<mosaic_0001>
module attributes {stable_mosaic.version = 11 : i64} {
  func.func @_fused_cnn_kernel(%arg0: memref<2x16x4xf32, #tpu.memory_space<vmem>>, %arg1: memref<3x4x8xf32, #tpu.memory_space<vmem>>, %arg2: memref<1x8xf32, #tpu.memory_space<vmem>>, %arg3: memref<3x8x8xf32, #tpu.memory_space<vmem>>, %arg4: memref<1x8xf32, #tpu.memory_space<vmem>>, %arg5: memref<3x8x4xf32, #tpu.memory_space<vmem>>, %arg6: memref<1x4xf32, #tpu.memory_space<vmem>>, %arg7: memref<2x16x4xf32, #tpu.memory_space<vmem>>, %arg8: memref<2x18x8xf32, #tpu.memory_space<vmem>>) attributes {dimension_semantics = [], scalar_prefetch = 0 : i64, scratch_operands = 1 : i64, tpu.core_type = #tpu.core_type<tc>} {
    %c0 = arith.constant 0 : index
    %c0_0 = arith.constant 0 : index
    %c0_1 = arith.constant 0 : index
    %0 = vector.load %arg0[%c0, %c0_0, %c0_1] : memref<2x16x4xf32, #tpu.memory_space<vmem>>, vector<2x16x4xf32>
    %cst = arith.constant 0.000000e+00 : f32
    %1 = vector.broadcast %cst : f32 to vector<2x18x8xf32>
    %c0_2 = arith.constant 0 : index
    %c0_3 = arith.constant 0 : index
    %c0_4 = arith.constant 0 : index
    %2 = vector.load %arg8[%c0_2, %c0_3, %c0_4] : memref<2x18x8xf32, #tpu.memory_space<vmem>>, vector<2x18x8xf32>
    tpu.vector_store %arg8[%c0_2, %c0_3, %c0_4], %1 {strides = array<i32>} : memref<2x18x8xf32, #tpu.memory_space<vmem>>, vector<2x18x8xf32>,
    %c0_5 = arith.constant 0 : index
    %c1 = arith.constant 1 : index
    %c0_6 = arith.constant 0 : index
    %3 = vector.load %arg8[%c0_5, %c1, %c0_6] : memref<2x18x8xf32, #tpu.memory_space<vmem>>, vector<2x16x4xf32>
    tpu.vector_store %arg8[%c0_5, %c1, %c0_6], %0 {strides = array<i32>} : memref<2x18x8xf32, #tpu.memory_space<vmem>>, vector<2x16x4xf32>,
    %c0_7 = arith.constant 0 : index
    %c0_8 = arith.constant 0 : index
    %c0_9 = arith.constant 0 : index
    %4 = vector.load %arg8[%c0_7, %c0_8, %c0_9] : memref<2x18x8xf32, #tpu.memory_space<vmem>>, vector<2x16x4xf32>
    %5 = vector.shape_cast %4 : vector<2x16x4xf32> to vector<32x4xf32>
    %c0_10 = arith.constant 0 : index
    %c0_11 = arith.constant 0 : index
    %c0_12 = arith.constant 0 : index
    %6 = vector.load %arg1[%c0_10, %c0_11, %c0_12] : memref<3x4x8xf32, #tpu.memory_space<vmem>>, vector<1x4x8xf32>
    %7 = vector.shape_cast %6 : vector<1x4x8xf32> to vector<4x8xf32>
    %cst_13 = arith.constant dense<0.000000e+00> : vector<32x8xf32>
    %8 = tpu.matmul %5, %7, %cst_13 {dimension_numbers = #tpu.dot_dimension_numbers<[1], [0], [0], [1], [0, 0, 1, 1], [], []>} : vector<32x4xf32>, vector<4x8xf32>, vector<32x8xf32> -> vector<32x8xf32>
    %c0_14 = arith.constant 0 : index
    %c1_15 = arith.constant 1 : index
    %c0_16 = arith.constant 0 : index
    %9 = vector.load %arg8[%c0_14, %c1_15, %c0_16] : memref<2x18x8xf32, #tpu.memory_space<vmem>>, vector<2x16x4xf32>
    %10 = vector.shape_cast %9 : vector<2x16x4xf32> to vector<32x4xf32>
    %c1_17 = arith.constant 1 : index
    %c0_18 = arith.constant 0 : index
    %c0_19 = arith.constant 0 : index
    %11 = vector.load %arg1[%c1_17, %c0_18, %c0_19] : memref<3x4x8xf32, #tpu.memory_space<vmem>>, vector<1x4x8xf32>
    %12 = vector.shape_cast %11 : vector<1x4x8xf32> to vector<4x8xf32>
    %cst_20 = arith.constant dense<0.000000e+00> : vector<32x8xf32>
    %13 = tpu.matmul %10, %12, %cst_20 {dimension_numbers = #tpu.dot_dimension_numbers<[1], [0], [0], [1], [0, 0, 1, 1], [], []>} : vector<32x4xf32>, vector<4x8xf32>, vector<32x8xf32> -> vector<32x8xf32>
    %14 = arith.addf %8, %13 : vector<32x8xf32>
    %c0_21 = arith.constant 0 : index
    %c2 = arith.constant 2 : index
    %c0_22 = arith.constant 0 : index
    %15 = vector.load %arg8[%c0_21, %c2, %c0_22] : memref<2x18x8xf32, #tpu.memory_space<vmem>>, vector<2x16x4xf32>
    %16 = vector.shape_cast %15 : vector<2x16x4xf32> to vector<32x4xf32>
    %c2_23 = arith.constant 2 : index
    %c0_24 = arith.constant 0 : index
    %c0_25 = arith.constant 0 : index
    %17 = vector.load %arg1[%c2_23, %c0_24, %c0_25] : memref<3x4x8xf32, #tpu.memory_space<vmem>>, vector<1x4x8xf32>
    %18 = vector.shape_cast %17 : vector<1x4x8xf32> to vector<4x8xf32>
    %cst_26 = arith.constant dense<0.000000e+00> : vector<32x8xf32>
    %19 = tpu.matmul %16, %18, %cst_26 {dimension_numbers = #tpu.dot_dimension_numbers<[1], [0], [0], [1], [0, 0, 1, 1], [], []>} : vector<32x4xf32>, vector<4x8xf32>, vector<32x8xf32> -> vector<32x8xf32>
    %20 = arith.addf %14, %19 : vector<32x8xf32>
    %c0_27 = arith.constant 0 : index
    %c0_28 = arith.constant 0 : index
    %21 = vector.load %arg2[%c0_27, %c0_28] : memref<1x8xf32, #tpu.memory_space<vmem>>, vector<1x8xf32>
    %22 = vector.broadcast %21 : vector<1x8xf32> to vector<32x8xf32>
    %23 = arith.addf %20, %22 : vector<32x8xf32>
    %24 = vector.shape_cast %23 : vector<32x8xf32> to vector<2x16x8xf32>
    %cst_29 = arith.constant 0.000000e+00 : f32
    %25 = vector.broadcast %cst_29 : f32 to vector<2x18x8xf32>
    %c0_30 = arith.constant 0 : index
    %c0_31 = arith.constant 0 : index
    %c0_32 = arith.constant 0 : index
    %26 = vector.load %arg8[%c0_30, %c0_31, %c0_32] : memref<2x18x8xf32, #tpu.memory_space<vmem>>, vector<2x18x8xf32>
    tpu.vector_store %arg8[%c0_30, %c0_31, %c0_32], %25 {strides = array<i32>} : memref<2x18x8xf32, #tpu.memory_space<vmem>>, vector<2x18x8xf32>,
    %c0_33 = arith.constant 0 : index
    %c1_34 = arith.constant 1 : index
    %c0_35 = arith.constant 0 : index
    %27 = vector.load %arg8[%c0_33, %c1_34, %c0_35] : memref<2x18x8xf32, #tpu.memory_space<vmem>>, vector<2x16x8xf32>
    tpu.vector_store %arg8[%c0_33, %c1_34, %c0_35], %24 {strides = array<i32>} : memref<2x18x8xf32, #tpu.memory_space<vmem>>, vector<2x16x8xf32>,
    %c0_36 = arith.constant 0 : index
    %c0_37 = arith.constant 0 : index
    %c0_38 = arith.constant 0 : index
    %28 = vector.load %arg8[%c0_36, %c0_37, %c0_38] : memref<2x18x8xf32, #tpu.memory_space<vmem>>, vector<2x16x8xf32>
    %29 = vector.shape_cast %28 : vector<2x16x8xf32> to vector<32x8xf32>
    %c0_39 = arith.constant 0 : index
    %c0_40 = arith.constant 0 : index
    %c0_41 = arith.constant 0 : index
    %30 = vector.load %arg3[%c0_39, %c0_40, %c0_41] : memref<3x8x8xf32, #tpu.memory_space<vmem>>, vector<1x8x8xf32>
    %31 = vector.shape_cast %30 : vector<1x8x8xf32> to vector<8x8xf32>
    %cst_42 = arith.constant dense<0.000000e+00> : vector<32x8xf32>
    %32 = tpu.matmul %29, %31, %cst_42 {dimension_numbers = #tpu.dot_dimension_numbers<[1], [0], [0], [1], [0, 0, 1, 1], [], []>} : vector<32x8xf32>, vector<8x8xf32>, vector<32x8xf32> -> vector<32x8xf32>
    %c0_43 = arith.constant 0 : index
    %c1_44 = arith.constant 1 : index
    %c0_45 = arith.constant 0 : index
    %33 = vector.load %arg8[%c0_43, %c1_44, %c0_45] : memref<2x18x8xf32, #tpu.memory_space<vmem>>, vector<2x16x8xf32>
    %34 = vector.shape_cast %33 : vector<2x16x8xf32> to vector<32x8xf32>
    %c1_46 = arith.constant 1 : index
    %c0_47 = arith.constant 0 : index
    %c0_48 = arith.constant 0 : index
    %35 = vector.load %arg3[%c1_46, %c0_47, %c0_48] : memref<3x8x8xf32, #tpu.memory_space<vmem>>, vector<1x8x8xf32>
    %36 = vector.shape_cast %35 : vector<1x8x8xf32> to vector<8x8xf32>
    %cst_49 = arith.constant dense<0.000000e+00> : vector<32x8xf32>
    %37 = tpu.matmul %34, %36, %cst_49 {dimension_numbers = #tpu.dot_dimension_numbers<[1], [0], [0], [1], [0, 0, 1, 1], [], []>} : vector<32x8xf32>, vector<8x8xf32>, vector<32x8xf32> -> vector<32x8xf32>
    %38 = arith.addf %32, %37 : vector<32x8xf32>
    %c0_50 = arith.constant 0 : index
    %c2_51 = arith.constant 2 : index
    %c0_52 = arith.constant 0 : index
    %39 = vector.load %arg8[%c0_50, %c2_51, %c0_52] : memref<2x18x8xf32, #tpu.memory_space<vmem>>, vector<2x16x8xf32>
    %40 = vector.shape_cast %39 : vector<2x16x8xf32> to vector<32x8xf32>
    %c2_53 = arith.constant 2 : index
    %c0_54 = arith.constant 0 : index
    %c0_55 = arith.constant 0 : index
    %41 = vector.load %arg3[%c2_53, %c0_54, %c0_55] : memref<3x8x8xf32, #tpu.memory_space<vmem>>, vector<1x8x8xf32>
    %42 = vector.shape_cast %41 : vector<1x8x8xf32> to vector<8x8xf32>
    %cst_56 = arith.constant dense<0.000000e+00> : vector<32x8xf32>
    %43 = tpu.matmul %40, %42, %cst_56 {dimension_numbers = #tpu.dot_dimension_numbers<[1], [0], [0], [1], [0, 0, 1, 1], [], []>} : vector<32x8xf32>, vector<8x8xf32>, vector<32x8xf32> -> vector<32x8xf32>
    %44 = arith.addf %38, %43 : vector<32x8xf32>
    %c0_57 = arith.constant 0 : index
    %c0_58 = arith.constant 0 : index
    %45 = vector.load %arg4[%c0_57, %c0_58] : memref<1x8xf32, #tpu.memory_space<vmem>>, vector<1x8xf32>
    %46 = vector.broadcast %45 : vector<1x8xf32> to vector<32x8xf32>
    %47 = arith.addf %44, %46 : vector<32x8xf32>
    %48 = vector.shape_cast %47 : vector<32x8xf32> to vector<2x16x8xf32>
    %cst_59 = arith.constant 0.000000e+00 : f32
    %49 = vector.broadcast %cst_59 : f32 to vector<2x18x8xf32>
    %c0_60 = arith.constant 0 : index
    %c0_61 = arith.constant 0 : index
    %c0_62 = arith.constant 0 : index
    %50 = vector.load %arg8[%c0_60, %c0_61, %c0_62] : memref<2x18x8xf32, #tpu.memory_space<vmem>>, vector<2x18x8xf32>
    tpu.vector_store %arg8[%c0_60, %c0_61, %c0_62], %49 {strides = array<i32>} : memref<2x18x8xf32, #tpu.memory_space<vmem>>, vector<2x18x8xf32>,
    %c0_63 = arith.constant 0 : index
    %c1_64 = arith.constant 1 : index
    %c0_65 = arith.constant 0 : index
    %51 = vector.load %arg8[%c0_63, %c1_64, %c0_65] : memref<2x18x8xf32, #tpu.memory_space<vmem>>, vector<2x16x8xf32>
    tpu.vector_store %arg8[%c0_63, %c1_64, %c0_65], %48 {strides = array<i32>} : memref<2x18x8xf32, #tpu.memory_space<vmem>>, vector<2x16x8xf32>,
    %c0_66 = arith.constant 0 : index
    %c0_67 = arith.constant 0 : index
    %c0_68 = arith.constant 0 : index
    %52 = vector.load %arg8[%c0_66, %c0_67, %c0_68] : memref<2x18x8xf32, #tpu.memory_space<vmem>>, vector<2x16x8xf32>
    %53 = vector.shape_cast %52 : vector<2x16x8xf32> to vector<32x8xf32>
    %c0_69 = arith.constant 0 : index
    %c0_70 = arith.constant 0 : index
    %c0_71 = arith.constant 0 : index
    %54 = vector.load %arg5[%c0_69, %c0_70, %c0_71] : memref<3x8x4xf32, #tpu.memory_space<vmem>>, vector<1x8x4xf32>
    %55 = vector.shape_cast %54 : vector<1x8x4xf32> to vector<8x4xf32>
    %cst_72 = arith.constant dense<0.000000e+00> : vector<32x4xf32>
    %56 = tpu.matmul %53, %55, %cst_72 {dimension_numbers = #tpu.dot_dimension_numbers<[1], [0], [0], [1], [0, 0, 1, 1], [], []>} : vector<32x8xf32>, vector<8x4xf32>, vector<32x4xf32> -> vector<32x4xf32>
    %c0_73 = arith.constant 0 : index
    %c1_74 = arith.constant 1 : index
    %c0_75 = arith.constant 0 : index
    %57 = vector.load %arg8[%c0_73, %c1_74, %c0_75] : memref<2x18x8xf32, #tpu.memory_space<vmem>>, vector<2x16x8xf32>
    %58 = vector.shape_cast %57 : vector<2x16x8xf32> to vector<32x8xf32>
    %c1_76 = arith.constant 1 : index
    %c0_77 = arith.constant 0 : index
    %c0_78 = arith.constant 0 : index
    %59 = vector.load %arg5[%c1_76, %c0_77, %c0_78] : memref<3x8x4xf32, #tpu.memory_space<vmem>>, vector<1x8x4xf32>
    %60 = vector.shape_cast %59 : vector<1x8x4xf32> to vector<8x4xf32>
    %cst_79 = arith.constant dense<0.000000e+00> : vector<32x4xf32>
    %61 = tpu.matmul %58, %60, %cst_79 {dimension_numbers = #tpu.dot_dimension_numbers<[1], [0], [0], [1], [0, 0, 1, 1], [], []>} : vector<32x8xf32>, vector<8x4xf32>, vector<32x4xf32> -> vector<32x4xf32>
    %62 = arith.addf %56, %61 : vector<32x4xf32>
    %c0_80 = arith.constant 0 : index
    %c2_81 = arith.constant 2 : index
    %c0_82 = arith.constant 0 : index
    %63 = vector.load %arg8[%c0_80, %c2_81, %c0_82] : memref<2x18x8xf32, #tpu.memory_space<vmem>>, vector<2x16x8xf32>
    %64 = vector.shape_cast %63 : vector<2x16x8xf32> to vector<32x8xf32>
    %c2_83 = arith.constant 2 : index
    %c0_84 = arith.constant 0 : index
    %c0_85 = arith.constant 0 : index
    %65 = vector.load %arg5[%c2_83, %c0_84, %c0_85] : memref<3x8x4xf32, #tpu.memory_space<vmem>>, vector<1x8x4xf32>
    %66 = vector.shape_cast %65 : vector<1x8x4xf32> to vector<8x4xf32>
    %cst_86 = arith.constant dense<0.000000e+00> : vector<32x4xf32>
    %67 = tpu.matmul %64, %66, %cst_86 {dimension_numbers = #tpu.dot_dimension_numbers<[1], [0], [0], [1], [0, 0, 1, 1], [], []>} : vector<32x8xf32>, vector<8x4xf32>, vector<32x4xf32> -> vector<32x4xf32>
    %68 = arith.addf %62, %67 : vector<32x4xf32>
    %c0_87 = arith.constant 0 : index
    %c0_88 = arith.constant 0 : index
    %69 = vector.load %arg6[%c0_87, %c0_88] : memref<1x4xf32, #tpu.memory_space<vmem>>, vector<1x4xf32>
    %70 = vector.broadcast %69 : vector<1x4xf32> to vector<32x4xf32>
    %71 = arith.addf %68, %70 : vector<32x4xf32>
    %72 = vector.shape_cast %71 : vector<32x4xf32> to vector<2x16x4xf32>
    %c0_89 = arith.constant 0 : index
    %c0_90 = arith.constant 0 : index
    %c0_91 = arith.constant 0 : index
    %73 = vector.load %arg0[%c0_89, %c0_90, %c0_91] : memref<2x16x4xf32, #tpu.memory_space<vmem>>, vector<2x16x4xf32>
    %74 = arith.addf %72, %73 : vector<2x16x4xf32>
    %c0_92 = arith.constant 0 : index
    %c0_93 = arith.constant 0 : index
    %c0_94 = arith.constant 0 : index
    %75 = vector.load %arg7[%c0_92, %c0_93, %c0_94] : memref<2x16x4xf32, #tpu.memory_space<vmem>>, vector<2x16x4xf32>
    tpu.vector_store %arg7[%c0_92, %c0_93, %c0_94], %74 {strides = array<i32>} : memref<2x16x4xf32, #tpu.memory_space<vmem>>, vector<2x16x4xf32>,
    return
  }
}

</mosaic_0001>

<bundles_post_ra>
// kernel: tpu_custom_call.1
= control target key start
LH: loop header
LB: loop body
LE: loop exit
PB: predicated region body
PF: predicated region fallthrough
CT: control target
= control target key end

     0   :  { %vm66_vm0 = vcmask 1043456   ;;  %vm30_vm1 = vcmask 64512   ;;  %vm38_vm2 = vcmask 31744   ;;  %v1226_v2 = vmov 0.0   ;;  %s1439_s1 = inlined_call_operand.vmem [shape: f32[3,4,8], index: 1, kind: input, shape index: {}]   ;;  %s1440_s0 = inlined_call_operand.vmem [shape: f32[2,16,4], index: 0, kind: input, shape index: {}]   ;;  %s1441_s3 = inlined_call_operand.vmem [shape: f32[3,8,8], index: 3, kind: input, shape index: {}]   ;;  %s1442_s2 = inlined_call_operand.vmem [shape: f32[1,8], index: 2, kind: input, shape index: {}]   ;;  %s1443_s5 = inlined_call_operand.vmem [shape: f32[3,8,4], index: 5, kind: input, shape index: {}]   ;;  %s1444_s4 = inlined_call_operand.vmem [shape: f32[1,8], index: 4, kind: input, shape index: {}]   ;;  %s1445_s6 = inlined_call_operand.vmem [shape: f32[1,4], index: 6, kind: input, shape index: {}]   ;;  %s1446_s7 = inlined_call_operand.vmem [shape: f32[2,16,4], index: 7, kind: output, shape index: {}]  }
   0x1   :  { %v1058_v0 = vld [vmem:[%s1439_s1 + $0x4] sm:$0xf]  ;;  %31 = vst.msk [vmem:[#allocation2] sm:$0xff] %vm30_vm1, %v1226_v2  ;;  %32 = vst.msk [vmem:[#allocation2 + $0x8] sm:$0xff] %vm30_vm1, %v1226_v2  ;;  %v1286_v3 = vld [vmem:[%s1440_s0 + $0x10] sm:$0xff]  ;;  %vm33_vm3 = vcmask 58368  }
   0x2   :  { %v1273_v1 = vld [vmem:[%s1440_s0] sm:$0xff]  ;;  %35 = vst.msk [vmem:[#allocation2 + $0x18] sm:$0xff] %vm30_vm1, %v1226_v2  ;;  %36 = vst.msk [vmem:[#allocation2 + $0x20] sm:$0xff] %vm30_vm1, %v1226_v2  ;;  %1223 = vmatprep.subr.msk.mxu1 %vm66_vm0, %v1058_v0  ;;  %1151 = vmatprep.subr.msk.mxu0 %vm66_vm0, %v1058_v0  ;;  %v1300_v5 = vld [vmem:[%s1440_s0 + $0x8] sm:$0xff] }
   0x3   :  { %39 = vst.msk [vmem:[#allocation2 + $0x1] sm:$0xff] %vm38_vm2, %v1273_v1  ;;  %41 = vst.msk [vmem:[#allocation2 + $0x19] sm:$0xff] %vm38_vm2, %v1286_v3  ;;  %v47_v4 = vld [vmem:[%s1439_s1] sm:$0xf]  ;;  %v1309_v6 = vld [vmem:[%s1440_s0 + $0x18] sm:$0xff]  ;;  %1224 = vmatpush3.msk.msra.mxu1 %vm66_vm0, %v1058_v0  ;;  %1152 = vmatpush3.msk.msra.mxu0 %vm66_vm0, %v1058_v0 }
   0x4   :  { %34 = vst.msk [vmem:[#allocation2 + $0x10] sm:$0x3] %vm33_vm3, %v1226_v2  ;;  %37 = vst.msk [vmem:[#allocation2 + $0x28] sm:$0x3] %vm33_vm3, %v1226_v2  ;;  %v1069_v7 = vld [vmem:[%s1439_s1 + $0x8] sm:$0xf]  ;;  %1159 = vmatprep.subr.msk.mxu1 %vm66_vm0, %v47_v4 }
   0x5   :  { %40 = vst.msk [vmem:[#allocation2 + $0x9] sm:$0xff] %vm38_vm2, %v1300_v5  ;;  %42 = vst.msk [vmem:[#allocation2 + $0x21] sm:$0xff] %vm38_vm2, %v1309_v6  ;;  %1167 = vmatprep.subr.msk.mxu0 %vm66_vm0, %v1069_v7  ;;  %v1076_v20 = vld [vmem:[%s1441_s3 + $0x8] sm:$0xff]  ;;  %v390_v21 = vld [vmem:[%s1441_s3] sm:$0xff] }
   0x6   :  { %v1085_v22 = vld [vmem:[%s1441_s3 + $0x10] sm:$0xff]  ;;  %v1075_v30 = vld [vmem:[%s1442_s2] ss:$0 sm:$0xff]  ;;  %v1091_v60 = vld [vmem:[%s1443_s5 + $0x8] sm:$0xff] }
   0x7   :  { %v723_v61 = vld [vmem:[%s1443_s5] sm:$0xff]  ;;  %v1100_v62 = vld [vmem:[%s1443_s5 + $0x10] sm:$0xff] }
   0xa   :  { %v48_v8 = vld [vmem:[#allocation2 + $0x1] sm:$0xff]  ;;  %v50_v9 = vld [vmem:[#allocation2 + $0x19] sm:$0xff] }
   0xb   :  { %v43_v10 = vld [vmem:[#allocation2] sm:$0xff]  ;;  %1153 = vmatprep.mubr.msk.f32.mxu0 %vm38_vm2, %v48_v8  ;;  %1156 = vmatprep.mubr.msk.f32.mxu1 %vm38_vm2, %v50_v9  ;;  %v45_v16 = vld [vmem:[#allocation2 + $0x18] sm:$0xff] }
   0xc   :  { %v49_v11 = vld [vmem:[#allocation2 + $0x9] sm:$0xff]  ;;  %v51_v12 = vld [vmem:[#allocation2 + $0x21] sm:$0xff] }
   0xd   :  { %v255_v13 = vld [vmem:[#allocation2 + $0x2] sm:$0xff]  ;;  %1154 = vmatmul.mubr.msk.f32.vlgmr.msra.gmra.mxu0 %vm38_vm2, %v49_v11  ;;  %1157 = vmatmul.mubr.msk.f32.vlgmr.msra.gmra.mxu1 %vm38_vm2, %v51_v12  ;;  %v256_v15 = vld [vmem:[#allocation2 + $0xa] sm:$0xff]  ;;  %v257_v17 = vld [vmem:[#allocation2 + $0x1a] sm:$0xff] }
   0xe   :  { %376 = vst.msk [vmem:[#allocation2] sm:$0xff] %vm30_vm1, %v1226_v2  ;;  %v44_v14 = vld [vmem:[#allocation2 + $0x8] sm:$0xff]  ;;  %1160 = vmatpush3.msk.msra.mxu1 %vm66_vm0, %v47_v4  ;;  %1168 = vmatpush3.msk.msra.mxu0 %vm66_vm0, %v1069_v7  ;;  %v46_v18 = vld [vmem:[#allocation2 + $0x20] sm:$0xff]  ;;  %379 = vst.msk [vmem:[#allocation2 + $0x18] sm:$0xff] %vm30_vm1, %v1226_v2 }
   0xf   :  { %378 = vst.msk [vmem:[#allocation2 + $0x10] sm:$0x3] %vm33_vm3, %v1226_v2  ;;  %v258_v19 = vld [vmem:[#allocation2 + $0x22] sm:$0xff]  ;;  %1161 = vmatprep.mubr.msk.f32.mxu1 %vm38_vm2, %v43_v10  ;;  %1169 = vmatprep.mubr.msk.f32.mxu0 %vm38_vm2, %v255_v13  ;;  %v1090_v12 = vld [vmem:[%s1444_s4] ss:$0 sm:$0xff] }
  0x10   :  { %377 = vst.msk [vmem:[#allocation2 + $0x8] sm:$0xff] %vm30_vm1, %v1226_v2  ;;  %380 = vst.msk [vmem:[#allocation2 + $0x20] sm:$0xff] %vm30_vm1, %v1226_v2  ;;  %1175 = vmatprep.subr.mxu1 %v1076_v20  ;;  %1183 = vmatprep.subr.mxu0 %v390_v21 }
  0x11   :  { %381 = vst.msk [vmem:[#allocation2 + $0x28] sm:$0x3] %vm33_vm3, %v1226_v2  ;;  %1162 = vmatmul.mubr.msk.f32.vlgmr.msra.gmra.mxu1 %vm38_vm2, %v44_v14  ;;  %1170 = vmatmul.mubr.msk.f32.vlgmr.msra.gmra.mxu0 %vm38_vm2, %v256_v15 }
  0x12   :  { %1164 = vmatprep.mubr.msk.f32.mxu1 %vm38_vm2, %v45_v16  ;;  %1172 = vmatprep.mubr.msk.f32.mxu0 %vm38_vm2, %v257_v17 }
  0x13   :  { %1176 = vmatpush3.msra.mxu1 %v1076_v20  ;;  %1184 = vmatpush3.msra.mxu0 %v390_v21 }
  0x14   :  { %1191 = vmatprep.subr.mxu1 %v1085_v22  ;;  %1199 = vmatprep.subr.mxu0 %v1091_v60 }
  0x15   :  { %1165 = vmatmul.mubr.msk.f32.gmra.mxu1 %vm38_vm2, %v46_v18  ;;  %1173 = vmatmul.mubr.msk.f32.gmra.mxu0 %vm38_vm2, %v258_v19 }
  0xcd   :  { %v1155_v23 = vpop.f32.mrf.mxu0  ;;  %v1158_v24 = vpop.f32.mrf.mxu1 }
  0xcf   :  { %v136_v25 = vpop.f32.mrf.mxu0  ;;  %v146_v26 = vpop.f32.mrf.mxu1 }
  0xd1   :  { %v1163_v27 = vpop.f32.mrf.mxu1  ;;  %v1171_v28 = vpop.f32.mrf.mxu0 }
  0xd2   :  { %v242_v29 = vadd.f32 %v1163_v27, %v1155_v23 }
  0xd3   :  { %v236_v31 = vpop.f32.mrf.mxu1  ;;  %v342_v32 = vpop.f32.mrf.mxu0 }
  0xd4   :  { %v362_v33 = vadd.f32 %v1171_v28, %v242_v29  ;;  %v237_v34 = vadd.f32 %v236_v31, %v136_v25 }
  0xd5   :  { %v1166_v35 = vpop.f32.mrf.mxu1  ;;  %v1174_v36 = vpop.f32.mrf.mxu0 }
  0xd6   :  { %v373_v37 = vadd.f32 %v1075_v30, %v362_v33  ;;  %v361_v38 = vadd.f32 %v342_v32, %v237_v34  ;;  %v252_v39 = vadd.f32 %v1166_v35, %v1158_v24 }
  0xd7   :  { %v246_v40 = vpop.f32.mrf.mxu1  ;;  %v352_v44 = vpop.f32.mrf.mxu0 }
  0xd8   :  { %383 = vst.msk [vmem:[#allocation2 + $0x9] sm:$0xff] %vm30_vm1, %v373_v37  ;;  %v372_v41 = vadd.f32 %v1075_v30, %v361_v38  ;;  %v364_v42 = vadd.f32 %v1174_v36, %v252_v39  ;;  %v247_v43 = vadd.f32 %v246_v40, %v146_v26 }
  0xda   :  { %382 = vst.msk [vmem:[#allocation2 + $0x1] sm:$0xff] %vm30_vm1, %v372_v41  ;;  %v375_v45 = vadd.f32 %v1075_v30, %v364_v42  ;;  %v363_v46 = vadd.f32 %v352_v44, %v247_v43 }
  0xdc   :  { %385 = vst.msk [vmem:[#allocation2 + $0x21] sm:$0xff] %vm30_vm1, %v375_v45  ;;  %v374_v47 = vadd.f32 %v1075_v30, %v363_v46 }
  0xde   :  { %384 = vst.msk [vmem:[#allocation2 + $0x19] sm:$0xff] %vm30_vm1, %v374_v47 }
  0xdf   :  { %v392_v48 = vld [vmem:[#allocation2 + $0x9] sm:$0xff] }
  0xe0   :  { %v592_v49 = vld [vmem:[#allocation2 + $0xa] sm:$0xff] }
  0xe1   :  { %711 = vst.msk [vmem:[#allocation2 + $0x10] sm:$0x3] %vm33_vm3, %v1226_v2  ;;  %v391_v50 = vld [vmem:[#allocation2 + $0x1] sm:$0xff] }
  0xe2   :  { %v386_v51 = vld [vmem:[#allocation2] sm:$0xff]  ;;  %v387_v52 = vld [vmem:[#allocation2 + $0x8] sm:$0xff]  ;;  %1177 = vmatprep.mubr.msk.f32.mxu1 %vm30_vm1, %v391_v50 }
  0xe3   :  { %1185 = vmatprep.mubr.msk.f32.mxu0 %vm30_vm1, %v386_v51  ;;  %v591_v53 = vld [vmem:[#allocation2 + $0x2] sm:$0xff]  ;;  %1178 = vmatmul.mubr.msk.f32.vlgmr.msra.gmra.mxu1 %vm30_vm1, %v392_v48 }
  0xe4   :  { %1186 = vmatmul.mubr.msk.f32.vlgmr.msra.gmra.mxu0 %vm30_vm1, %v387_v52  ;;  %v394_v54 = vld [vmem:[#allocation2 + $0x21] sm:$0xff]  ;;  %709 = vst.msk [vmem:[#allocation2] sm:$0xff] %vm30_vm1, %v1226_v2  ;;  %710 = vst.msk [vmem:[#allocation2 + $0x8] sm:$0xff] %vm30_vm1, %v1226_v2  ;;  %1192 = vmatpush3.msra.mxu1 %v1085_v22 }
  0xe5   :  { %v594_v55 = vld [vmem:[#allocation2 + $0x22] sm:$0xff]  ;;  %v393_v56 = vld [vmem:[#allocation2 + $0x19] sm:$0xff]  ;;  %1207 = vmatprep.subr.mxu1 %v723_v61  ;;  %1200 = vmatpush3.msra.mxu0 %v1091_v60 }
  0xe6   :  { %714 = vst.msk [vmem:[#allocation2 + $0x28] sm:$0x3] %vm33_vm3, %v1226_v2  ;;  %v388_v57 = vld [vmem:[#allocation2 + $0x18] sm:$0xff]  ;;  %v389_v58 = vld [vmem:[#allocation2 + $0x20] sm:$0xff]  ;;  %1180 = vmatprep.mubr.msk.f32.mxu1 %vm30_vm1, %v393_v56  ;;  %1215 = vmatprep.subr.mxu0 %v1100_v62 }
  0xe7   :  { %1188 = vmatprep.mubr.msk.f32.mxu0 %vm30_vm1, %v388_v57  ;;  %v593_v59 = vld [vmem:[#allocation2 + $0x1a] sm:$0xff]  ;;  %1181 = vmatmul.mubr.msk.f32.gmra.mxu1 %vm30_vm1, %v394_v54 }
  0xe8   :  { %1189 = vmatmul.mubr.msk.f32.gmra.mxu0 %vm30_vm1, %v389_v58  ;;  %712 = vst.msk [vmem:[#allocation2 + $0x18] sm:$0xff] %vm30_vm1, %v1226_v2  ;;  %713 = vst.msk [vmem:[#allocation2 + $0x20] sm:$0xff] %vm30_vm1, %v1226_v2  ;;  %1193 = vmatprep.mubr.msk.f32.mxu1 %vm30_vm1, %v591_v53 }
  0xeb   :  { %1194 = vmatmul.mubr.msk.f32.vlgmr.msra.gmra.mxu1 %vm30_vm1, %v592_v49  ;;  %v1105_v49 = vld [vmem:[%s1445_s6] ss:$0 sm:$0xff] }
  0xec   :  { %1196 = vmatprep.mubr.msk.f32.mxu1 %vm30_vm1, %v593_v59  ;;  %1208 = vmatpush3.msra.mxu1 %v723_v61 }
  0xef   :  { %1197 = vmatmul.mubr.msk.f32.gmra.mxu1 %vm30_vm1, %v594_v55 }
 0x1a3   :  { %v1179_v63 = vpop.f32.mrf.mxu1 }
 0x1a4   :  { %v1187_v0 = vpop.f32.mrf.mxu0 }
 0x1a5   :  { %v475_v2 = vpop.f32.mrf.mxu1  ;;  %v578_v10 = vadd.f32 %v1187_v0, %v1179_v63 }
 0x1a6   :  { %v572_v4 = vpop.f32.mrf.mxu0 }
 0x1a7   :  { %v1182_v7 = vpop.f32.mrf.mxu1  ;;  %v573_v13 = vadd.f32 %v572_v4, %v475_v2 }
 0x1a8   :  { %v1190_v8 = vpop.f32.mrf.mxu0 }
 0x1a9   :  { %v485_v9 = vpop.f32.mrf.mxu1  ;;  %v588_v17 = vadd.f32 %v1190_v8, %v1182_v7 }
 0x1aa   :  { %v582_v15 = vpop.f32.mrf.mxu0 }
 0x1ab   :  { %v1195_v11 = vpop.f32.mrf.mxu1  ;;  %v583_v21 = vadd.f32 %v582_v15, %v485_v9 }
 0x1ac   :  { %v695_v14 = vadd.f32 %v1195_v11, %v578_v10 }
 0x1ad   :  { %v675_v16 = vpop.f32.mrf.mxu1 }
 0x1ae   :  { %v706_v18 = vadd.f32 %v1090_v12, %v695_v14  ;;  %v694_v19 = vadd.f32 %v675_v16, %v573_v13 }
 0x1af   :  { %v1198_v20 = vpop.f32.mrf.mxu1 }
 0x1b0   :  { %716 = vst.msk [vmem:[#allocation2 + $0x9] sm:$0xff] %vm30_vm1, %v706_v18  ;;  %v705_v22 = vadd.f32 %v1090_v12, %v694_v19  ;;  %v697_v23 = vadd.f32 %v1198_v20, %v588_v17 }
 0x1b1   :  { %v685_v24 = vpop.f32.mrf.mxu1 }
 0x1b2   :  { %715 = vst.msk [vmem:[#allocation2 + $0x1] sm:$0xff] %vm30_vm1, %v705_v22  ;;  %v708_v25 = vadd.f32 %v1090_v12, %v697_v23  ;;  %v696_v26 = vadd.f32 %v685_v24, %v583_v21 }
 0x1b4   :  { %718 = vst.msk [vmem:[#allocation2 + $0x21] sm:$0xff] %vm30_vm1, %v708_v25  ;;  %v707_v27 = vadd.f32 %v1090_v12, %v696_v26 }
 0x1b6   :  { %717 = vst.msk [vmem:[#allocation2 + $0x19] sm:$0xff] %vm30_vm1, %v707_v27 }
 0x1b7   :  { %v725_v31 = vld [vmem:[#allocation2 + $0x9] sm:$0xff] }
 0x1b8   :  { %v925_v37 = vld [vmem:[#allocation2 + $0xa] sm:$0xff] }
 0x1b9   :  { %v724_v28 = vld [vmem:[#allocation2 + $0x1] sm:$0xff] }
 0x1ba   :  { %v719_v29 = vld [vmem:[#allocation2] sm:$0xff]  ;;  %v720_v30 = vld [vmem:[#allocation2 + $0x8] sm:$0xff]  ;;  %1201 = vmatprep.mubr.msk.f32.mxu0 %vm30_vm1, %v724_v28 }
 0x1bb   :  { %1209 = vmatprep.mubr.msk.f32.mxu1 %vm30_vm1, %v719_v29  ;;  %1202 = vmatmul.mubr.msk.f32.vlgmr.msra.gmra.mxu0 %vm30_vm1, %v725_v31  ;;  %v727_v35 = vld [vmem:[#allocation2 + $0x21] sm:$0xff] }
 0x1bc   :  { %1210 = vmatmul.mubr.msk.f32.vlgmr.msra.gmra.mxu1 %vm30_vm1, %v720_v30  ;;  %1216 = vmatpush3.msra.mxu0 %v1100_v62  ;;  %v924_v36 = vld [vmem:[#allocation2 + $0x2] sm:$0xff] }
 0x1bd   :  { %v726_v32 = vld [vmem:[#allocation2 + $0x19] sm:$0xff]  ;;  %v927_v39 = vld [vmem:[#allocation2 + $0x22] sm:$0xff] }
 0x1be   :  { %v721_v33 = vld [vmem:[#allocation2 + $0x18] sm:$0xff]  ;;  %v722_v34 = vld [vmem:[#allocation2 + $0x20] sm:$0xff]  ;;  %1204 = vmatprep.mubr.msk.f32.mxu0 %vm30_vm1, %v726_v32 }
 0x1bf   :  { %1212 = vmatprep.mubr.msk.f32.mxu1 %vm30_vm1, %v721_v33  ;;  %1205 = vmatmul.mubr.msk.f32.gmra.mxu0 %vm30_vm1, %v727_v35  ;;  %v926_v38 = vld [vmem:[#allocation2 + $0x1a] sm:$0xff] }
 0x1c0   :  { %1213 = vmatmul.mubr.msk.f32.gmra.mxu1 %vm30_vm1, %v722_v34  ;;  %1217 = vmatprep.mubr.msk.f32.mxu0 %vm30_vm1, %v924_v36 }
 0x1c3   :  { %1218 = vmatmul.mubr.msk.f32.vlgmr.msra.gmra.mxu0 %vm30_vm1, %v925_v37 }
 0x1c4   :  { %1220 = vmatprep.mubr.msk.f32.mxu0 %vm30_vm1, %v926_v38 }
 0x1c7   :  { %1221 = vmatmul.mubr.msk.f32.gmra.mxu0 %vm30_vm1, %v927_v39 }
 0x27b   :  { %v1203_v40 = vpop.f32.mrf.mxu0 }
 0x27c   :  { %v1211_v41 = vpop.f32.mrf.mxu1 }
 0x27d   :  { %v808_v42 = vpop.f32.mrf.mxu0  ;;  %v911_v47 = vadd.f32 %v1211_v41, %v1203_v40 }
 0x27e   :  { %v905_v43 = vpop.f32.mrf.mxu1 }
 0x27f   :  { %v1206_v44 = vpop.f32.mrf.mxu0  ;;  %v906_v50 = vadd.f32 %v905_v43, %v808_v42 }
 0x280   :  { %v1214_v45 = vpop.f32.mrf.mxu1 }
 0x281   :  { %v818_v46 = vpop.f32.mrf.mxu0  ;;  %v921_v54 = vadd.f32 %v1214_v45, %v1206_v44 }
 0x282   :  { %v915_v52 = vpop.f32.mrf.mxu1 }
 0x283   :  { %v1219_v48 = vpop.f32.mrf.mxu0  ;;  %v916_v58 = vadd.f32 %v915_v52, %v818_v46 }
 0x284   :  { %v1028_v51 = vadd.f32 %v1219_v48, %v911_v47 }
 0x285   :  { %v1008_v53 = vpop.f32.mrf.mxu0 }
 0x286   :  { %v1039_v55 = vadd.f32 %v1105_v49, %v1028_v51  ;;  %v1027_v56 = vadd.f32 %v1008_v53, %v906_v50 }
 0x287   :  { %v1222_v57 = vpop.f32.mrf.mxu0 }
 0x288   :  { %v1047_v59 = vadd.f32 %v1039_v55, %v1300_v5  ;;  %v1038_v60 = vadd.f32 %v1105_v49, %v1027_v56  ;;  %v1030_v61 = vadd.f32 %v1222_v57, %v921_v54 }
 0x289   :  { %v1018_v62 = vpop.f32.mrf.mxu0 }
 0x28a   :  { %1051 = vst.msk [vmem:[%s1446_s7 + $0x8] sm:$0xff] %vm38_vm2, %v1047_v59  ;;  %v1046_v63 = vadd.f32 %v1038_v60, %v1273_v1  ;;  %v1041_v0 = vadd.f32 %v1105_v49, %v1030_v61  ;;  %v1029_v2 = vadd.f32 %v1018_v62, %v916_v58 }
 0x28c   :  { %1050 = vst.msk [vmem:[%s1446_s7] sm:$0xff] %vm38_vm2, %v1046_v63  ;;  %v1049_v4 = vadd.f32 %v1041_v0, %v1309_v6  ;;  %v1040_v5 = vadd.f32 %v1105_v49, %v1029_v2 }
 0x28e   :  { %1053 = vst.msk [vmem:[%s1446_s7 + $0x18] sm:$0xff] %vm38_vm2, %v1049_v4  ;;  %v1048_v7 = vadd.f32 %v1040_v5, %v1286_v3 }
 0x290   :  { %1052 = vst.msk [vmem:[%s1446_s7 + $0x10] sm:$0xff] %vm38_vm2, %v1048_v7 }

</bundles_post_ra>
